<compile_context>
chip_gen: v7x
topology: tpu7x:2x2x1
jax: 0.10.0
libtpu: 0.0.40
codegen_flags: <defaults>
</compile_context>

<pallas_src>
import functools

import jax
import jax.numpy as jnp
from jax import lax
from jax.experimental import pallas as pl
from jax.experimental.pallas import tpu as pltpu


def _gated_pooling_kernel(x_ref, wfc_ref, bfc_ref, wg_ref,
                          pooled_ref, rw_ref, *, inv_temp):
    x = x_ref[...]                                    # [tb, L, D], native dtype
    wg = wg_ref[...]                                  # [1, D] lane-dense gate weight

    # ---- gate logits: VPU multiply in x's dtype, f32-accumulated D reduce ----
    logits = jnp.sum(x * wg.astype(x.dtype)[:, None, :], axis=-1,
                     dtype=jnp.float32)               # [tb, L] f32

    # ---- softmax over L (f32) ----
    # The reference subtracts a *global* max; softmax is shift-invariant, so
    # the per-row max below is equivalent and keeps batches independent.
    stable = logits * inv_temp
    row_max = jnp.max(stable, axis=1, keepdims=True)
    e = jnp.exp(stable - row_max)
    denom = jnp.sum(e, axis=1, keepdims=True)         # [tb, 1]
    rw = e * (1.0 / denom)                            # exact divide -> sum rw == 1

    # ---- weighted token sum (VPU mul + XLU sublane reduce, f32 accumulate) ----
    xw = jnp.sum(x * rw[:, :, None], axis=1)          # [tb, D] f32 (rw stays f32)

    # ---- fc once per batch row on the MXU ----
    wfc = wfc_ref[...]                                # [D, D] resident
    pooled = jnp.dot(xw.astype(wfc.dtype), wfc,
                     preferred_element_type=jnp.float32,
                     precision=lax.Precision.HIGHEST) # [tb, D] f32
    pooled = pooled + bfc_ref[...].astype(jnp.float32)

    pooled_ref[...] = pooled.astype(pooled_ref.dtype)
    rw_ref[...] = rw                                  # lane-dense [tb, L] f32 store

    # TODO(synk): sparse=True path (torch.topk over L + renormalize) is
    # data-dependent selection and is not implemented in this kernel.


def _vmem_capacity_bytes():
    """Physical VMEM per TensorCore; conservative 64 MiB (v7x) fallback."""
    try:
        cap = getattr(pltpu.get_tpu_info(), "vmem_capacity_bytes", None)
        if cap:
            return int(cap)
    except Exception:
        pass
    return 64 * 1024 * 1024


def _batch_semantics(num_steps):
    """CORE_PARALLEL shards the batch grid axis across v7x's 2 TensorCores;
    fall back to "parallel" on single-TC chips / when the query fails."""
    if num_steps >= 2:
        try:
            info = pltpu.get_tpu_info()
            n = 1
            for attr in ("num_cores", "core_count", "num_tensorcores",
                         "tensorcores_per_chip", "num_tensor_cores"):
                v = getattr(info, attr, None)
                if v:
                    n = max(n, int(v))
            if n > 1:
                return (pltpu.CORE_PARALLEL,)
        except Exception:
            pass
    return ("parallel",)


def _pick_tile_b(B, L, D, x_itemsize, wfc_itemsize, vmem_cap):
    """Largest batch tile whose double-buffered working set (2x x tile + 2x
    W_fc + outputs) stays within ~half of physical VMEM, targeting ~8 MiB per
    x buffer, while keeping >=2 grid steps when B allows (pipeline overlap and
    v7x 2-TC splitting)."""
    gran = 16 if x_itemsize < 4 else 8           # sublane packing granularity
    row_bytes = max(1, L * D * x_itemsize)
    resident = 2 * D * D * wfc_itemsize + 8 * D * 4   # W_fc is double-buffered too
    budget = max(512 * 1024, (vmem_cap // 2 - resident) // 2)
    per_buf = min(8 * 1024 * 1024, budget)
    tb = max(gran, per_buf // row_bytes // gran * gran)
    if B > gran:                                 # keep at least 2 grid steps
        half = -(-B // 2)
        half = -(-half // gran) * gran
        tb = min(tb, max(gran, half))
    tb = min(tb, -(-B // gran) * gran)           # never exceed padded B
    return tb


def gated_pooling(x, w_fc, b_fc, w_gate, temp=1.0, tile_b=None):
    """x: [B, L, D]; w_fc: [D, D] (torch W_fc^T, used as x @ w_fc);
    b_fc: [1, D]; w_gate: [D, 1] (torch W_gate^T).
    Returns (pooled [B, D] float32, routing_weights [B, L, 1] float32)."""
    B, L, D = x.shape
    b_fc2 = b_fc.reshape(1, D)
    w_gate2 = w_gate.reshape(1, D)

    vmem_cap = _vmem_capacity_bytes()
    itemsize = x.dtype.itemsize
    if tile_b is None:
        tb = _pick_tile_b(B, L, D, itemsize, w_fc.dtype.itemsize, vmem_cap)
    else:
        assert tile_b % 8 == 0, tile_b
        tb = tile_b

    # Pad B up to a tile multiple (pad rows -> uniform softmax, sliced off below).
    B_pad = -(-B // tb) * tb
    x_in = x if B_pad == B else jnp.pad(x, ((0, B_pad - B), (0, 0), (0, 0)))
    grid = (B_pad // tb,)

    # VMEM budget: x tile + W_fc + small vectors + outputs, all double-buffered
    # (Pallas double-buffers W_fc even with a constant index_map).
    vmem_bytes = (2 * tb * L * D * itemsize
                  + 2 * D * D * w_fc.dtype.itemsize
                  + 4 * D * (b_fc.dtype.itemsize + w_gate.dtype.itemsize)
                  + 2 * tb * D * 4
                  + 2 * tb * L * 4)
    ceiling = max(vmem_cap * 3 // 4, vmem_cap - 16 * 1024 * 1024)  # leave headroom
    vmem_limit = int(min(ceiling, max(16 * 1024 * 1024,
                                      vmem_bytes + vmem_bytes // 4)))

    cost = pl.CostEstimate(
        flops=int(2 * B_pad * D * D + 4 * B_pad * L * D + 6 * B_pad * L),
        transcendentals=int(B_pad * L),
        bytes_accessed=int(B_pad * L * D * itemsize
                           + D * D * w_fc.dtype.itemsize
                           + D * (b_fc.dtype.itemsize + w_gate.dtype.itemsize)
                           + B_pad * D * 4 + B_pad * L * 4),
    )

    kernel = functools.partial(_gated_pooling_kernel, inv_temp=1.0 / float(temp))

    pooled, rw = pl.pallas_call(
        kernel,
        out_shape=(
            jax.ShapeDtypeStruct((B_pad, D), jnp.float32),  # pooled (f32, torch promotion)
            jax.ShapeDtypeStruct((B_pad, L), jnp.float32),  # routing_weights (lane-dense)
        ),
        grid_spec=pltpu.PrefetchScalarGridSpec(
            num_scalar_prefetch=0,
            grid=grid,
            in_specs=[
                pl.BlockSpec((tb, L, D), lambda i: (i, 0, 0)),  # x: tiled over B
                pl.BlockSpec((D, D), lambda i: (0, 0)),         # W_fc: resident
                pl.BlockSpec((1, D), lambda i: (0, 0)),         # b_fc: resident
                pl.BlockSpec((1, D), lambda i: (0, 0)),         # w_gate: resident
            ],
            out_specs=(
                pl.BlockSpec((tb, D), lambda i: (i, 0)),
                pl.BlockSpec((tb, L), lambda i: (i, 0)),
            ),
        ),
        compiler_params=pltpu.CompilerParams(
            dimension_semantics=_batch_semantics(grid[0]),
            vmem_limit_bytes=vmem_limit,
        ),
        cost_estimate=cost,
    )(x_in, w_fc, b_fc2, w_gate2)

    # Drop pad rows; trailing singleton dim is free layout plumbing.
    return pooled[:B], rw[:B, :, None]


def _reference(x, w_fc, b_fc, w_gate, temp=1.0):
    hp = lax.Precision.HIGHEST
    x32 = x.astype(jnp.float32)
    hidden = jnp.einsum("bld,de->ble", x32, w_fc.astype(jnp.float32),
                        precision=hp) + b_fc.astype(jnp.float32)[0]
    logits = jnp.einsum("bld,do->blo", x32, w_gate.astype(jnp.float32),
                        precision=hp)[..., 0]
    stable = (logits - jnp.max(logits)) / temp
    rw = jax.nn.softmax(stable, axis=1).astype(jnp.float32)
    pooled = jnp.sum(hidden * rw[:, :, None], axis=1)
    return pooled, rw[:, :, None]


if __name__ == "__main__":
    B, L, D = 16, 8, 32
    key = jax.random.PRNGKey(0)
    kx, kfc, kbf, kg = jax.random.split(key, 4)

    x = jax.random.normal(kx, (B, L, D), dtype=jnp.float32)
    # nn.Linear layouts, pre-transposed:
    #   gate: Linear(D, 1, bias=False) -> weight [1, D] -> transposed [D, 1]
    #   fc:   Linear(D, D)             -> weight [D, D] -> transposed [D, D], bias [D]
    w_fc = jax.random.normal(kfc, (D, D), dtype=jnp.float32) * (1.0 / jnp.sqrt(D))
    b_fc = jax.random.normal(kbf, (1, D), dtype=jnp.float32) * 0.01
    w_gate = jax.random.normal(kg, (D, 1), dtype=jnp.float32) * (1.0 / jnp.sqrt(D))

    # f32 run: auto tiling picks tb=8 -> grid=(2,) exercising the pipeline.
    pooled, rw = gated_pooling(x, w_fc, b_fc, w_gate, temp=1.0)
    jax.block_until_ready((pooled, rw))
    pooled_ref, rw_ref = _reference(x, w_fc, b_fc, w_gate, temp=1.0)
    assert pooled.shape == (B, D) and rw.shape == (B, L, 1)
    assert jnp.allclose(pooled, pooled_ref, atol=1e-3, rtol=1e-3)
    assert jnp.allclose(rw, rw_ref, atol=1e-3, rtol=1e-3)

    # Ragged-batch path (B padded to a tile multiple inside the wrapper).
    Br = 12
    pooled_r, rw_r = gated_pooling(x[:Br], w_fc, b_fc, w_gate, temp=0.7)
    jax.block_until_ready((pooled_r, rw_r))
    pooled_rr, rw_rr = _reference(x[:Br], w_fc, b_fc, w_gate, temp=0.7)
    assert pooled_r.shape == (Br, D) and rw_r.shape == (Br, L, 1)
    assert jnp.allclose(pooled_r, pooled_rr, atol=1e-3, rtol=1e-3)
    assert jnp.allclose(rw_r, rw_rr, atol=1e-3, rtol=1e-3)

    # bf16-input path (halves HBM x traffic on v6e/v7x); loose check + finiteness.
    pooled_bf, rw_bf = gated_pooling(x.astype(jnp.bfloat16),
                                     w_fc.astype(jnp.bfloat16), b_fc,
                                     w_gate.astype(jnp.bfloat16), temp=1.0)
    jax.block_until_ready((pooled_bf, rw_bf))
    assert pooled_bf.shape == (B, D) and rw_bf.shape == (B, L, 1)
    assert bool(jnp.all(jnp.isfinite(pooled_bf)))
    assert bool(jnp.all(jnp.isfinite(rw_bf)))
    assert jnp.allclose(pooled_bf, pooled_ref, atol=5e-2, rtol=5e-2)

    print("KERNEL_OK")
</pallas_src>

<mosaic_0001>
module attributes {stable_mosaic.version = 11 : i64} {
  func.func @_gated_pooling_kernel(%arg0: i32, %arg1: memref<8x8x32xf32, #tpu.memory_space<vmem>>, %arg2: memref<32x32xf32, #tpu.memory_space<vmem>>, %arg3: memref<1x32xf32, #tpu.memory_space<vmem>>, %arg4: memref<1x32xf32, #tpu.memory_space<vmem>>, %arg5: memref<8x32xf32, #tpu.memory_space<vmem>>, %arg6: memref<8x8xf32, #tpu.memory_space<vmem>>) attributes {dimension_semantics = [#tpu.dimension_semantics<parallel>], iteration_bounds = array<i64: 2>, scalar_prefetch = 0 : i64, scratch_operands = 0 : i64, tpu.core_type = #tpu.core_type<tc>, window_params = [{transform_indices = @transform_0, window_bounds = array<i64: 8, 8, 32>}, {pipeline_mode = #tpu.pipeline_mode<synchronous>, transform_indices = @transform_1, window_bounds = array<i64: 32, 32>}, {pipeline_mode = #tpu.pipeline_mode<synchronous>, transform_indices = @transform_2, window_bounds = array<i64: 1, 32>}, {pipeline_mode = #tpu.pipeline_mode<synchronous>, transform_indices = @transform_3, window_bounds = array<i64: 1, 32>}, {transform_indices = @transform_4, window_bounds = array<i64: 8, 32>}, {transform_indices = @transform_5, window_bounds = array<i64: 8, 8>}]} {
    %c0 = arith.constant 0 : index
    %c0_0 = arith.constant 0 : index
    %c0_1 = arith.constant 0 : index
    %0 = vector.load %arg1[%c0, %c0_0, %c0_1] : memref<8x8x32xf32, #tpu.memory_space<vmem>>, vector<8x8x32xf32>
    %c0_2 = arith.constant 0 : index
    %c0_3 = arith.constant 0 : index
    %1 = vector.load %arg4[%c0_2, %c0_3] : memref<1x32xf32, #tpu.memory_space<vmem>>, vector<1x32xf32>
    %2 = vector.shape_cast %1 : vector<1x32xf32> to vector<1x1x32xf32>
    %3 = vector.broadcast %2 : vector<1x1x32xf32> to vector<8x8x32xf32>
    %4 = arith.mulf %0, %3 : vector<8x8x32xf32>
    %cst = arith.constant dense<0.000000e+00> : vector<8x8xf32>
    %5 = vector.multi_reduction <add>, %4, %cst [2] : vector<8x8x32xf32> to vector<8x8xf32>
    %cst_4 = arith.constant 1.000000e+00 : f32
    %6 = vector.broadcast %cst_4 : f32 to vector<8x8xf32>
    %7 = arith.mulf %5, %6 : vector<8x8xf32>
    %cst_5 = arith.constant dense<0xFF800000> : vector<8xf32>
    %8 = vector.multi_reduction <maximumf>, %7, %cst_5 [1] : vector<8x8xf32> to vector<8xf32>
    %9 = vector.shape_cast %8 : vector<8xf32> to vector<8x1xf32>
    %10 = vector.broadcast %9 : vector<8x1xf32> to vector<8x8xf32>
    %11 = arith.subf %7, %10 : vector<8x8xf32>
    %12 = math.exp %11 : vector<8x8xf32>
    %cst_6 = arith.constant dense<0.000000e+00> : vector<8xf32>
    %13 = vector.multi_reduction <add>, %12, %cst_6 [1] : vector<8x8xf32> to vector<8xf32>
    %14 = vector.shape_cast %13 : vector<8xf32> to vector<8x1xf32>
    %cst_7 = arith.constant 1.000000e+00 : f32
    %15 = vector.broadcast %cst_7 : f32 to vector<8x1xf32>
    %16 = arith.divf %15, %14 : vector<8x1xf32>
    %17 = vector.broadcast %16 : vector<8x1xf32> to vector<8x8xf32>
    %18 = arith.mulf %12, %17 : vector<8x8xf32>
    %19 = vector.shape_cast %18 : vector<8x8xf32> to vector<8x8x1xf32>
    %20 = vector.broadcast %19 : vector<8x8x1xf32> to vector<8x8x32xf32>
    %21 = arith.mulf %0, %20 : vector<8x8x32xf32>
    %cst_8 = arith.constant dense<0.000000e+00> : vector<8x32xf32>
    %22 = vector.multi_reduction <add>, %21, %cst_8 [1] : vector<8x8x32xf32> to vector<8x32xf32>
    %c0_9 = arith.constant 0 : index
    %c0_10 = arith.constant 0 : index
    %23 = vector.load %arg2[%c0_9, %c0_10] : memref<32x32xf32, #tpu.memory_space<vmem>>, vector<32x32xf32>
    %cst_11 = arith.constant dense<0.000000e+00> : vector<8x32xf32>
    %24 = tpu.matmul %22, %23, %cst_11 {dimension_numbers = #tpu.dot_dimension_numbers<[1], [0], [0], [1], [0, 0, 1, 1], [], []>, precision = #tpu.contract_precision<fp32>} : vector<8x32xf32>, vector<32x32xf32>, vector<8x32xf32> -> vector<8x32xf32>
    %c0_12 = arith.constant 0 : index
    %c0_13 = arith.constant 0 : index
    %25 = vector.load %arg3[%c0_12, %c0_13] : memref<1x32xf32, #tpu.memory_space<vmem>>, vector<1x32xf32>
    %26 = vector.broadcast %25 : vector<1x32xf32> to vector<8x32xf32>
    %27 = arith.addf %24, %26 : vector<8x32xf32>
    %c0_14 = arith.constant 0 : index
    %c0_15 = arith.constant 0 : index
    %28 = vector.load %arg5[%c0_14, %c0_15] : memref<8x32xf32, #tpu.memory_space<vmem>>, vector<8x32xf32>
    tpu.vector_store %arg5[%c0_14, %c0_15], %27 {strides = array<i32>} : memref<8x32xf32, #tpu.memory_space<vmem>>, vector<8x32xf32>,
    %c0_16 = arith.constant 0 : index
    %c0_17 = arith.constant 0 : index
    %29 = vector.load %arg6[%c0_16, %c0_17] : memref<8x8xf32, #tpu.memory_space<vmem>>, vector<8x8xf32>
    tpu.vector_store %arg6[%c0_16, %c0_17], %18 {strides = array<i32>} : memref<8x8xf32, #tpu.memory_space<vmem>>, vector<8x8xf32>,
    return
  }
  func.func @transform_0(%arg0: i32) -> (i32, i32, i32) {
    %c0_i32 = arith.constant 0 : i32
    %c0_i32_0 = arith.constant 0 : i32
    %c0_i32_1 = arith.constant 0 : i32
    return %arg0, %c0_i32, %c0_i32_0 : i32, i32, i32
  }
  func.func @transform_1(%arg0: i32) -> (i32, i32) {
    %c0_i32 = arith.constant 0 : i32
    %c0_i32_0 = arith.constant 0 : i32
    %c0_i32_1 = arith.constant 0 : i32
    return %c0_i32, %c0_i32_0 : i32, i32
  }
  func.func @transform_2(%arg0: i32) -> (i32, i32) {
    %c0_i32 = arith.constant 0 : i32
    %c0_i32_0 = arith.constant 0 : i32
    %c0_i32_1 = arith.constant 0 : i32
    return %c0_i32, %c0_i32_0 : i32, i32
  }
  func.func @transform_3(%arg0: i32) -> (i32, i32) {
    %c0_i32 = arith.constant 0 : i32
    %c0_i32_0 = arith.constant 0 : i32
    %c0_i32_1 = arith.constant 0 : i32
    return %c0_i32, %c0_i32_0 : i32, i32
  }
  func.func @transform_4(%arg0: i32) -> (i32, i32) {
    %c0_i32 = arith.constant 0 : i32
    %c0_i32_0 = arith.constant 0 : i32
    return %arg0, %c0_i32 : i32, i32
  }
  func.func @transform_5(%arg0: i32) -> (i32, i32) {
    %c0_i32 = arith.constant 0 : i32
    %c0_i32_0 = arith.constant 0 : i32
    return %arg0, %c0_i32 : i32, i32
  }
}

</mosaic_0001>

<bundles_post_ra>
// kernel: tpu_custom_call.1
= control target key start
LH: loop header
LB: loop body
LE: loop exit
PB: predicated region body
PF: predicated region fallthrough
CT: control target
= control target key end

     0   :  { %11 = vsyncpa [#allocation3], 0  ;;  %s2209_s0 = inlined_call_operand.hbm [shape: f32[16,8,32], index: 0, kind: input, shape index: {}]   ;;  %s2210_s1 = inlined_call_operand.hbm [shape: f32[32,32], index: 1, kind: input, shape index: {}]   ;;  %s2211_s2 = inlined_call_operand.vmem [shape: f32[1,32], index: 2, kind: input, shape index: {}]   ;;  %s2212_s3 = inlined_call_operand.vmem [shape: f32[1,32], index: 3, kind: input, shape index: {}]   ;;  %s2213_s4 = inlined_call_operand.hbm [shape: f32[16,32], index: 4, kind: output, shape index: {0}]   ;;  %s2214_s5 = inlined_call_operand.vmem [shape: f32[16,8], index: 5, kind: output, shape index: {1}]  }
   0x1   :  { %13 = vsyncpa [#allocation3 + $0x1], 0 }
   0x2   :  { %14 = vsyncpa [#allocation6], 0 }
   0x3   :  { %15 = vsyncpa [#allocation4], 0 }
   0x4   :  { %17 = vsyncpa [#allocation4 + $0x1], 0  ;;  %s1767_s18 = smov 0   ;;  %s1769_s19 = smov 0  }
   0x5   :  { %s1771_s20 = smov 0   ;;  %s1773_s21 = smov 0  }
   0x6 LB: > { %s1788_s22 = sadd.s32 4294967295, %s1726_s21   ;;  %s1354_s23 = sadd.s32 4294967294, %s1726_s21   ;;  %s1726_s21 = sphi %s1773_s21, %s2234_s21   ;;  %s1722_s20 = sphi %s1771_s20, %s2233_s20   ;;  %s1718_s19 = sphi %s1769_s19, %s2232_s19   ;;  %s1714_s18 = sphi %s1767_s18, %s2231_s18  }
   0x7   : > { %p43_p0 = scmp.ne.s32.totalorder %s1718_s19, %s1714_s18  ;;  %p2215_p1 = scmp.eq.s32.totalorder %s1788_s22, 0 }
   0x8   : > { %p136_p3 = scmp.eq.s32.totalorder %s1354_s23, 1  ;;  %p1355_p5 = scmp.ge.s32.totalorder %s1726_s21, 1 }
   0x9   : > { %p1797_p4 = por %p2215_p1, %p43_p0  ;;  %p169_p7 = scmp.lt.s32.totalorder %s1726_s21, 3 }
   0xa   : > { %p1802_p6 = por %p136_p3, %p43_p0  ;;  %s1728_s27 = smov [#allocation5]  }
   0xb   : > { %s2218_s24 = scalar_select %p1797_p4, 1, 0 }
   0xc   : > { %s2219_s25 = scalar_select %p1802_p6, 1, 0 }
   0xd   : > { %p1807_p8 = pnand %p1355_p5, %p169_p7  ;;  %s181_s28 = sshll.u32 %s1728_s27, 4  ;;  %s1811_s28 = int_to_ptr.vmem [resolvable:$true] %s181_s28 }
   0xe   : > { %s1823_s30 = sadd.s32 1, %s1726_s21   ;;  %s30_s6 = sadd.s32 1, %s1722_s20 }
   0xf   : > { %s2220_s26 = scalar_select %p1807_p8, 1, 0 }
  0x10   : > { %p1523_p9 = pneg %p1807_p8  ;;  %s27_s7 = ssub.s32 %s1726_s21, %s1823_s30 }
  0x11   : > { %s1598_s10 = scalar_lea.hbm %s2210_s1, 512 }
  0x12   : > { %p1818_p11 = pnand %p1523_p9, %p2215_p1  ;;  %p1599_p12 = scmp.ne.s32.totalorder %s2210_s1, %s1598_s10 }
  0x13   : > { %p1605_p5 = scmp.lt.u32.totalorder %s1598_s10, %s2210_s1 }
  0x14   : > { %p1600_p13 = pneg %p1818_p11 }
  0x16   : > { %p1601_p0 = pnand %p1600_p13, %p1599_p12 }
  0x18   : > { %p1602_p3 = pneg %p1601_p0 }
  0x1a   : > { %p1607_p7 = pnand %p1605_p5, %p1602_p3 }
  0x1c   : > { %1610 = shalt.err (!%p1607_p7)
}
  0x1d   : > { %s1611_s15 = scalar_lea.vmem %s1811_s28, 512  ;;  %p1619_p2 = scmp.lt.s32.totalorder %s1811_s28, %s1811_s28 }
  0x1e   : > { %p1612_p9 = scmp.ne.s32.totalorder %s1811_s28, %s1611_s15  ;;  %p1620_p6 = scmp.lt.s32.totalorder %s1611_s15, %s1611_s15 }
  0x20   : > { %p1614_p10 = pnand %p1612_p9, %p1600_p13  ;;  %p1621_p4 = por %p1620_p6, %p1619_p2 }
  0x22   : > { %p1615_p1 = pneg %p1614_p10 }
  0x24   : > { %p1622_p8 = pnand %p1621_p4, %p1615_p1 }
  0x26   : > { %1625 = shalt.err (!%p1622_p8)
}
  0x27   : > { %s1729_s16 = smov 128   ;;  %s1730_s17 = smov 8  }
  0x28   : > { %1526 = dma.hbm_to_vmem [thread:$0]  (!%p1818_p11), %s2210_s1, 512, %s1811_s28, [#allocation6], %s1729_s16, %s1729_s16, %s1730_s17  }
  0x29   : > { %p28_p1 = scmp.eq.s32.totalorder %s27_s7, 0  ;;  %p37_p2 = scmp.ne.s32.totalorder %s1722_s20, %s1718_s19 }
  0x2a   : > { %p38_p4 = scmp.eq.s32.totalorder %s1726_s21, 0  ;;  %p1536_p6 = scmp.lt.s32.totalorder %s1726_s21, 2 }
  0x2b   : > { %s1857_s8 = scalar_select %p28_p1, %s1722_s20, %s30_s6  }
  0x2c   : > { %p39_p8 = por %p38_p4, %p37_p2  ;;  %p2222_p10 = scmp.eq.s32.totalorder %s1788_s22, 1 }
  0x2d   : > { %s201_s29 = sand.u32 1, %s1722_s20   ;;  %s1372_s10 = sshll.u32 %s1726_s21, 10 }
  0x2e   : > { %p1861_p12 = por %p2222_p10, %p37_p2  ;;  %s1358_s11 = sshll.u32 %s201_s29, 6 }
  0x2f   : > { %s1870_s14 = scalar_lea.hbm %s2209_s0, %s1372_s10  ;;  %s205_s28 = scalar_lea.vmem [#allocation2], %s1358_s11 }
  0x30   : > { %s212_s6 = sshll.u32 %s205_s28, 4  ;;  %p1872_p11 = pnand %p1536_p6, %p39_p8  ;;  %s1876_s6 = int_to_ptr.vmem [resolvable:$true] %s212_s6 }
  0x31   : > { %s1878_s15 = scalar_lea.sflag [#allocation3], %s201_s29  ;;  %s1626_s23 = scalar_lea.hbm %s1870_s14, 1024 }
  0x32   : > { %p1627_p13 = scmp.ne.s32.totalorder %s1870_s14, %s1626_s23  ;;  %p1628_p0 = pneg %p1872_p11 }
  0x33   : > { %s1631_s11 = scalar_lea.hbm %s2209_s0, 2048  ;;  %p1632_p7 = scmp.lt.u32.totalorder %s1870_s14, %s2209_s0 }
  0x34   : > { %p1629_p3 = pnand %p1628_p0, %p1627_p13  ;;  %p1633_p9 = scmp.lt.u32.totalorder %s1631_s11, %s1626_s23 }
  0x35   : > { %p1635_p2 = scmp.lt.u32.totalorder %s1626_s23, %s1870_s14 }
  0x36   : > { %p1630_p5 = pneg %p1629_p3  ;;  %p1634_p1 = por %p1633_p9, %p1632_p7 }
  0x38   : > { %p1636_p4 = por %p1635_p2, %p1634_p1 }
  0x3a   : > { %p1637_p6 = pnand %p1636_p4, %p1630_p5 }
  0x3c   : > { %1640 = shalt.err (!%p1637_p6)
}
  0x3d   : > { %s1641_s29 = scalar_lea.vmem %s1876_s6, 1024  ;;  %s1731_s28 = smov [#allocation2]  }
  0x3e   : > { %p1642_p8 = scmp.ne.s32.totalorder %s1876_s6, %s1641_s29  ;;  %s1646_s27 = sshll.u32 %s1731_s28, 4  ;;  %s1647_s27 = int_to_ptr.vmem [resolvable:$false] %s1646_s27 }
  0x3f   : > { %s1648_s10 = scalar_lea.vmem %s1647_s27, 2048  ;;  %p1649_p3 = scmp.lt.s32.totalorder %s1876_s6, %s1647_s27 }
  0x40   : > { %p1644_p10 = pnand %p1642_p8, %p1628_p0  ;;  %p1650_p7 = scmp.lt.s32.totalorder %s1648_s10, %s1641_s29 }
  0x42   : > { %p1645_p13 = pneg %p1644_p10  ;;  %p1651_p9 = por %p1650_p7, %p1649_p3 }
  0x44   : > { %p1652_p1 = pnand %p1651_p9, %p1645_p13 }
  0x46   : > { %1655 = shalt.err (!%p1652_p1)
}
  0x47   : > { %1530 = dma.hbm_to_vmem [thread:$0]  (!%p1872_p11), %s1870_s14, 1024, %s1876_s6, %s1878_s15, %s1729_s16, %s1729_s16, %s1730_s17  }
  0x48   : > { %p2225_p0 = scmp.ne.s32.totalorder %s2220_s26, 0 }
  0x49   : > { %s1912_s23 = sand.u32 (!%p2225_p0), 1, %s1718_s19   ;;  %p2226_p5 = scmp.ne.s32.totalorder (!%p2225_p0), %s2218_s24, 0 }
  0x4a   : > { %224 = sbr.rel (%p2225_p0) target bundleno = 1150 (0x47e), region = 36  ;;  %s1362_s11 = sshll.u32 (!%p2225_p0), %s1912_s23, 6 }
  0x4b   : > { %s227_s12 = scalar_lea.sflag (!%p2225_p0), [#allocation3], %s1912_s23  ;;  %s230_s13 = scalar_lea.vmem (!%p2225_p0), [#allocation2], %s1362_s11 }
  0x51   : > { %1701 = dma.done.wait (%p2226_p5), %s227_s12, 1024  }
  0x52   : > { %1703 = vsyncadd (%p2226_p5), %s227_s12, 4294966272  ;;  %p2227_p2 = scmp.eq.s32.totalorder %s1788_s22, 0 }
  0x54   : > { %1705 = dma.done.wait (%p2227_p2), [#allocation6], 512   ;;  %p2228_p11 = pmov %p2227_p2 }
  0x55   : > { %v1924_v0 = vld [vmem:[%s230_s13] sm:$0xff]  ;;  %vm293_vm0 = vcmask 261120   ;;  %v1929_v2 = vld [vmem:[%s230_s13 + $0x10] sm:$0xff]  ;;  %v1933_v5 = vld [vmem:[%s230_s13 + $0x8] sm:$0xff]  ;;  %v326_v25 = vlaneseq  ;;  %vm360_vm1 = vcmask 1041409   ;;  %vm362_vm2 = vcmask 1042434  }
  0x56   : > { %1707 = vsyncadd (%p2228_p11), [#allocation6], 4294966784  ;;  %v1366_v1 = vld [vmem:[%s2212_s3] ss:$0 sm:$0xff]  ;;  %v1935_v6 = vld [vmem:[%s230_s13 + $0x18] sm:$0xff]  ;;  %vm364_vm3 = vcmask 1043459  }
  0x57   : > { %v285_v3 = vmul.f32 %v1366_v1, %v1924_v0  ;;  %v287_v4 = vmul.f32 %v1366_v1, %v1929_v2  ;;  %v286_v7 = vmul.f32 %v1366_v1, %v1933_v5  ;;  %v288_v8 = vmul.f32 %v1366_v1, %v1935_v6  ;;  %v1939_v9 = vld [vmem:[%s230_s13 + $0x20] sm:$0xff]  ;;  %v1941_v10 = vld [vmem:[%s230_s13 + $0x28] sm:$0xff]  ;;  %v1949_v17 = vld [vmem:[%s230_s13 + $0x30] sm:$0xff]  ;;  %p266_p4 = scmp.lt.s32.totalorder %s1788_s22, 1  ;;  %s1364_s15 = sshll.u32 %s1912_s23, 3 }
  0x58   : > { %v289_v15 = vmul.f32 %v1366_v1, %v1939_v9  ;;  %v290_v16 = vmul.f32 %v1366_v1, %v1941_v10  ;;  %v1951_v18 = vld [vmem:[%s230_s13 + $0x38] sm:$0xff]  ;;  %v291_v21 = vmul.f32 %v1366_v1, %v1949_v17  ;;  %v327_v26 = vand.u32 127, %v326_v25  ;;  %s1369_s27 = sshll.u32 %s1788_s22, 7  ;;  %s258_s10 = scalar_lea.vmem [#allocation7], %s1364_s15 }
  0x59   : > { %v294_v11 = vsel %vm293_vm0, %v285_v3, 0.0  ;;  %v300_v12 = vsel %vm293_vm0, %v287_v4, 0.0  ;;  %v297_v13 = vsel %vm293_vm0, %v286_v7, 0.0  ;;  %v303_v14 = vsel %vm293_vm0, %v288_v8, 0.0  ;;  %s2098_s24 = scalar_select %p266_p4, %s1788_s22, 1 }
  0x5a   : > { %295 = vadd.xlane.f32.xlu0 %v294_v11  ;;  %301 = vadd.xlane.f32.xlu1 %v300_v12  ;;  %v306_v19 = vsel %vm293_vm0, %v289_v15, 0.0  ;;  %v309_v20 = vsel %vm293_vm0, %v290_v16, 0.0  ;;  %v292_v22 = vmul.f32 %v1366_v1, %v1951_v18  ;;  %v312_v23 = vsel %vm293_vm0, %v291_v21, 0.0  ;;  %s1247_s11 = sshll.u32 %s258_s10, 4  ;;  %s2164_s26 = scalar_lea.hbm %s2213_s4, %s1369_s27  ;;  %s2166_s11 = int_to_ptr.vmem [resolvable:$true] %s1247_s11 }
  0x5b   : > { %v1959_v27 = vshrl.u32 %v326_v25, 7  ;;  %vm366_vm4 = vcmask 1044484   ;;  %vm368_vm5 = vcmask 1045509   ;;  %vm370_vm6 = vcmask 1046534   ;;  %s1365_s17 = sshll.u32 %s2098_s24, 3  ;;  %s1230_s16 = scalar_lea.sflag [#allocation4], %s1912_s23 }
  0x5c   : > { %v315_v24 = vsel %vm293_vm0, %v292_v22, 0.0  ;;  %vm372_vm7 = vcmask 1047559   ;;  %vm375_vm8 = vcmask 64512   ;;  %v1732_v53 = vmov 0   ;;  %s269_s7 = scalar_lea.vmem %s2214_s5, %s1365_s17  ;;  %s1656_s24 = scalar_lea.vmem %s2166_s11, 128 }
  0x5d   : > { %v1962_v30 = vsub.s32 %v327_v26, %v1959_v27  ;;  %1579 = vset.pattern.permute.xlu0 %v1732_v53  ;;  %1578 = vset.pattern.permute.xlu1 %v1732_v53  ;;  %v382_v54 = vsub.s32 0, %v1959_v27  ;;  %v386_v55 = vsub.s32 1, %v1959_v27  ;;  %v390_v56 = vsub.s32 2, %v1959_v27  ;;  %p1657_p6 = scmp.ne.s32.totalorder %s2166_s11, %s1656_s24  ;;  %s1736_s22 = smov [#allocation7]  }
  0x5e   : > { %298 = vadd.xlane.f32.xlu0 %v297_v13  ;;  %304 = vadd.xlane.f32.xlu1 %v303_v14  ;;  %v394_v57 = vsub.s32 3, %v1959_v27  ;;  %v398_v62 = vsub.s32 4, %v1959_v27  ;;  %v402_v11 = vsub.s32 5, %v1959_v27  ;;  %v406_v15 = vsub.s32 6, %v1959_v27  ;;  %s1660_s17 = sshll.u32 %s1736_s22, 4  ;;  %s1661_s17 = int_to_ptr.vmem [resolvable:$false] %s1660_s17 }
  0x5f   : > { %v410_v21 = vsub.s32 7, %v1959_v27  ;;  %vm1734_vm9 = vmmov 0   ;;  %p1658_p8 = pnand %p1657_p6, %p1861_p12  ;;  %s1662_s14 = scalar_lea.vmem %s1661_s17, 256 }
  0x60   : > { %p1663_p13 = scmp.lt.s32.totalorder %s2166_s11, %s1661_s17  ;;  %p1664_p3 = scmp.lt.s32.totalorder %s1662_s14, %s1656_s24 }
  0x61   : > { %p1659_p10 = pneg %p1658_p8 }
  0x62   : > { %307 = vadd.xlane.f32.xlu0 %v306_v19  ;;  %310 = vadd.xlane.f32.xlu1 %v309_v20  ;;  %p1665_p7 = por %p1664_p3, %p1663_p13 }
  0x64   : > { %p1666_p9 = pnand %p1665_p7, %p1659_p10 }
  0x66   : > { %313 = vadd.xlane.f32.xlu0 %v312_v23  ;;  %316 = vadd.xlane.f32.xlu1 %v315_v24 }
  0xe7   : > { %v296_v28 = vpop.xlane.xlu0 %295  ;;  %v302_v29 = vpop.xlane.xlu1 %301 }
  0xe8   : > { %v331_v33 = vrot.slane %v296_v28, %v1962_v30  ;;  %v339_v36 = vrot.slane %v302_v29, %v1962_v30 }
  0xeb   : > { %v299_v31 = vpop.xlane.xlu0 %298  ;;  %v305_v32 = vpop.xlane.xlu1 %304 }
  0xec   : > { %v335_v34 = vrot.slane %v299_v31, %v1962_v30  ;;  %v343_v35 = vrot.slane %v305_v32, %v1962_v30 }
  0xee   : > { %v361_v37 = vsel %vm360_vm1, %v335_v34, %v331_v33 }
  0xef   : > { %v363_v38 = vsel %vm362_vm2, %v339_v36, %v361_v37  ;;  %v308_v39 = vpop.xlane.xlu0 %307  ;;  %v311_v40 = vpop.xlane.xlu1 %310 }
  0xf0   : > { %v365_v41 = vsel %vm364_vm3, %v343_v35, %v363_v38  ;;  %v347_v42 = vrot.slane %v308_v39, %v1962_v30  ;;  %v351_v43 = vrot.slane %v311_v40, %v1962_v30 }
  0xf2   : > { %v367_v44 = vsel %vm366_vm4, %v347_v42, %v365_v41 }
  0xf3   : > { %v314_v45 = vpop.xlane.xlu0 %313  ;;  %v317_v46 = vpop.xlane.xlu1 %316  ;;  %v369_v49 = vsel %vm368_vm5, %v351_v43, %v367_v44 }
  0xf4   : > { %v355_v47 = vrot.slane %v314_v45, %v1962_v30  ;;  %v359_v48 = vrot.slane %v317_v46, %v1962_v30 }
  0xf6   : > { %v371_v50 = vsel %vm370_vm6, %v355_v47, %v369_v49 }
  0xf7   : > { %v373_v51 = vsel %vm372_vm7, %v359_v48, %v371_v50 }
  0xf8   : > { %v376_v52 = vsel %vm375_vm8, %v373_v51, -inf }
  0xf9   : > { %377 = vmax.xlane.f32.xlu0 %v376_v52 }
 0x186   : > { %v378_v58 = vpop.xlane.xlu0 %377 }
 0x187   : > { %v383_v59 = vrot.slane %v378_v58, %v382_v54  ;;  %v387_v60 = vrot.slane %v378_v58, %v386_v55  ;;  %v391_v61 = vrot.slane %v378_v58, %v390_v56  ;;  %v395_v63 = vrot.slane %v378_v58, %v394_v57 }
 0x188   : > { %v399_v12 = vrot.slane %v378_v58, %v398_v62  ;;  %v403_v16 = vrot.slane %v378_v58, %v402_v11  ;;  %v407_v22 = vrot.slane %v378_v58, %v406_v15 }
 0x189   : > { %v420_v1 = vsub.f32 %v296_v28, %v383_v59  ;;  %v421_v3 = vsub.f32 %v299_v31, %v387_v60  ;;  %v422_v4 = vsub.f32 %v302_v29, %v391_v61  ;;  %v423_v13 = vsub.f32 %v305_v32, %v395_v63 }
 0x18a   : > { %v424_v19 = vsub.f32 %v308_v39, %v399_v12  ;;  %v425_v23 = vsub.f32 %v311_v40, %v403_v16  ;;  %v411_v28 = vrot.slane %v378_v58, %v410_v21  ;;  %v426_v29 = vsub.f32 %v314_v45, %v407_v22 }
 0x18b   : > { %v428_v7 = vmul.f32 1.442695, %v420_v1  ;;  %v430_v8 = vmul.f32 1.442695, %v421_v3  ;;  %v432_v14 = vmul.f32 1.442695, %v422_v4 }
 0x18c   : > { %v434_v20 = vmul.f32 1.442695, %v423_v13  ;;  %v436_v24 = vmul.f32 1.442695, %v424_v19  ;;  %v438_v31 = vmul.f32 1.442695, %v425_v23  ;;  %v427_v33 = vsub.f32 %v317_v46, %v411_v28 }
 0x18d   : > { %1580 = vpow2.f32 %v428_v7  ;;  %v440_v34 = vmul.f32 1.442695, %v426_v29 }
 0x18e   : > { %1582 = vpow2.f32 %v430_v8  ;;  %v442_v36 = vmul.f32 1.442695, %v427_v33  ;;  %v674_v33 = vld [vmem:[#allocation5] sm:$0xff] }
 0x18f   : > { %1584 = vpow2.f32 %v432_v14 }
 0x190   : > { %1586 = vpow2.f32 %v434_v20 }
 0x191   : > { %1588 = vpow2.f32 %v436_v24 }
 0x192   : > { %1590 = vpow2.f32 %v438_v31 }
 0x193   : > { %1592 = vpow2.f32 %v440_v34  ;;  %v676_v34 = vld [vmem:[#allocation5 + $0x10] sm:$0xff] }
 0x194   : > { %1594 = vpow2.f32 %v442_v36 }
 0x197   : > { %v1581_v25 = vpop.eup %1580 }
 0x198   : > { %v1583_v26 = vpop.eup %1582  ;;  %453 = vperm.xlu1 %1578, %v1581_v25  }
 0x199   : > { %456 = vperm.xlu0 %1579, %v1583_v26   ;;  %v1585_v32 = vpop.eup %1584 }
 0x19a   : > { %v1587_v35 = vpop.eup %1586 }
 0x19b   : > { %v1589_v37 = vpop.eup %1588 }
 0x19c   : > { %459 = vperm.xlu1 %1578, %v1585_v32   ;;  %v1591_v38 = vpop.eup %1590 }
 0x19d   : > { %v1593_v39 = vpop.eup %1592 }
 0x19e   : > { %v1595_v40 = vpop.eup %1594 }
 0x1a0   : > { %462 = vperm.xlu1 %1578, %v1587_v35  }
 0x1a4   : > { %465 = vperm.xlu1 %1578, %v1589_v37  }
 0x1a8   : > { %468 = vperm.xlu1 %1578, %v1591_v38  }
 0x1ac   : > { %471 = vperm.xlu1 %1578, %v1593_v39  }
 0x1b0   : > { %474 = vperm.xlu1 %1578, %v1595_v40  }
 0x217   : > { %v454_v41 = vpop.permute.xlu1 %453 }
 0x218   : > { %v457_v45 = vpop.permute.xlu0 %456  ;;  %v479_v48 = vrot.slane %v454_v41, %v1962_v30 }
 0x219   : > { %v483_v47 = vrot.slane %v457_v45, %v1962_v30 }
 0x21b   : > { %v460_v42 = vpop.permute.xlu1 %459  ;;  %v508_v53 = vsel %vm360_vm1, %v483_v47, %v479_v48 }
 0x21c   : > { %v487_v49 = vrot.slane %v460_v42, %v1962_v30 }
 0x21e   : > { %v509_v59 = vsel %vm362_vm2, %v487_v49, %v508_v53 }
 0x21f   : > { %v463_v43 = vpop.permute.xlu1 %462 }
 0x220   : > { %v491_v50 = vrot.slane %v463_v43, %v1962_v30 }
 0x222   : > { %v510_v61 = vsel %vm364_vm3, %v491_v50, %v509_v59 }
 0x223   : > { %v466_v44 = vpop.permute.xlu1 %465 }
 0x224   : > { %v495_v51 = vrot.slane %v466_v44, %v1962_v30 }
 0x226   : > { %v511_v63 = vsel %vm366_vm4, %v495_v51, %v510_v61 }
 0x227   : > { %v469_v46 = vpop.permute.xlu1 %468 }
 0x228   : > { %v499_v58 = vrot.slane %v469_v46, %v1962_v30 }
 0x22a   : > { %v512_v3 = vsel %vm368_vm5, %v499_v58, %v511_v63 }
 0x22b   : > { %v472_v52 = vpop.permute.xlu1 %471 }
 0x22c   : > { %v503_v60 = vrot.slane %v472_v52, %v1962_v30 }
 0x22e   : > { %v513_v7 = vsel %vm370_vm6, %v503_v60, %v512_v3 }
 0x22f   : > { %v475_v1 = vpop.permute.xlu1 %474 }
 0x230   : > { %v507_v4 = vrot.slane %v475_v1, %v1962_v30 }
 0x232   : > { %v514_v8 = vsel %vm372_vm7, %v507_v4, %v513_v7 }
 0x233   : > { %v516_v12 = vsel %vm375_vm8, %v514_v8, 0.0 }
 0x234   : > { %517 = vadd.xlane.f32.xlu1 %v516_v12 }
 0x2c1   : > { %v518_v13 = vpop.xlane.xlu1 %517 }
 0x2c2   : > { %1596 = vrcp.f32 %v518_v13 }
 0x2cc   : > { %v1597_v14 = vpop.eup %1596 }
 0x2cd   : > { %v525_v16 = vrot.slane %v1597_v14, %v382_v54  ;;  %v529_v20 = vrot.slane %v1597_v14, %v386_v55  ;;  %v533_v23 = vrot.slane %v1597_v14, %v390_v56  ;;  %v537_v28 = vrot.slane %v1597_v14, %v394_v57 }
 0x2ce   : > { %v541_v31 = vrot.slane %v1597_v14, %v398_v62  ;;  %v545_v55 = vrot.slane %v1597_v14, %v402_v11  ;;  %v549_v56 = vrot.slane %v1597_v14, %v406_v15  ;;  %v553_v57 = vrot.slane %v1597_v14, %v410_v21  ;;  %v675_v62 = vld [vmem:[#allocation5 + $0x8] sm:$0xff] }
 0x2cf   : > { %v562_v19 = vmul.f32 %v1581_v25, %v525_v16  ;;  %v563_v22 = vmul.f32 %v1583_v26, %v529_v20  ;;  %v564_v24 = vmul.f32 %v1585_v32, %v533_v23  ;;  %v565_v29 = vmul.f32 %v1587_v35, %v537_v28 }
 0x2d0   : > { %v566_v54 = vmul.f32 %v1589_v37, %v541_v31  ;;  %v567_v25 = vmul.f32 %v1591_v38, %v545_v55  ;;  %v568_v26 = vmul.f32 %v1593_v39, %v549_v56  ;;  %v569_v32 = vmul.f32 %v1595_v40, %v553_v57  ;;  %v677_v37 = vld [vmem:[#allocation5 + $0x18] sm:$0xff] }
 0x2d1   : > { %572 = vperm.xlu0 %1579, %v562_v19   ;;  %v1733_v35 = vmov 0.0|0.0   ;;  %v703_v11 = vand.u32 4294901760, %v674_v33  ;;  %v706_v36 = vand.u32 4294901760, %v675_v62  ;;  %v709_v15 = vand.u32 4294901760, %v676_v34 }
 0x2d2   : > { %1487 = vmatprep.subr.bf16.mxu0 %v1733_v35  ;;  %1469 = vmatprep.subr.bf16.mxu1 %v1733_v35  ;;  %v712_v38 = vand.u32 4294901760, %v677_v37  ;;  %v1735_v39 = vmov 0.0  }
 0x2d3   : > { %1444 = vmatprep.mubr.msk.f32.mxu0 %vm1734_vm9, %v1735_v39  ;;  %1411 = vmatprep.mubr.msk.f32.mxu1 %vm1734_vm9, %v1735_v39  ;;  %v2042_v27 = vpack.c.bf16 %v706_v36, %v703_v11  ;;  %v2044_v21 = vsub.f32 %v674_v33, %v703_v11  ;;  %v2046_v40 = vsub.f32 %v675_v62, %v706_v36 }
 0x2d4   : > { %v2048_v41 = vsub.f32 %v676_v34, %v709_v15  ;;  %v2050_v42 = vsub.f32 %v677_v37, %v712_v38  ;;  %v2054_v43 = vpack.c.bf16 %v712_v38, %v709_v15 }
 0x2d5   : > { %577 = vperm.xlu0 %1579, %v563_v22   ;;  %1489 = vmatpush3.bf16.msra.mxu0 %v2042_v27  ;;  %v784_v44 = vand.u32 4294901760, %v2044_v21  ;;  %v791_v45 = vand.u32 4294901760, %v2046_v40  ;;  %v1482_v3 = vpack.c.bf16 %v2046_v40, %v2044_v21 }
 0x2d6   : > { %1471 = vmatpush3.bf16.msra.mxu1 %v2042_v27  ;;  %1490 = vmatprep.subr.bf16.mxu0 %v1733_v35  ;;  %v798_v49 = vand.u32 4294901760, %v2048_v41  ;;  %v805_v50 = vand.u32 4294901760, %v2050_v42  ;;  %v1485_v4 = vpack.c.bf16 %v2050_v42, %v2048_v41 }
 0x2d7   : > { %1472 = vmatprep.subr.bf16.mxu1 %v1733_v35  ;;  %v2064_v46 = vpack.c.bf16 %v791_v45, %v784_v44  ;;  %v785_v47 = vsub.f32 %v2044_v21, %v784_v44  ;;  %v792_v48 = vsub.f32 %v2046_v40, %v791_v45  ;;  %v1367_v21 = vld [vmem:[%s2211_s2] ss:$0 sm:$0xff] }
 0x2d8   : > { %v2070_v53 = vpack.c.bf16 %v805_v50, %v798_v49  ;;  %v799_v58 = vsub.f32 %v2048_v41, %v798_v49  ;;  %v806_v59 = vsub.f32 %v2050_v42, %v805_v50 }
 0x2d9   : > { %582 = vperm.xlu0 %1579, %v564_v24   ;;  %1492 = vmatpush3.bf16.msra.mxu0 %v2054_v43  ;;  %v786_v51 = vand.u32 4294901760, %v785_v47  ;;  %v793_v52 = vand.u32 4294901760, %v792_v48 }
 0x2da   : > { %1474 = vmatpush3.bf16.msra.mxu1 %v2054_v43  ;;  %1493 = vmatprep.subr.bf16.mxu0 %v1733_v35  ;;  %v800_v61 = vand.u32 4294901760, %v799_v58  ;;  %v807_v63 = vand.u32 4294901760, %v806_v59 }
 0x2db   : > { %1475 = vmatprep.subr.bf16.mxu1 %v1733_v35  ;;  %v2074_v60 = vpack.c.bf16 %v793_v52, %v786_v51 }
 0x2dc   : > { %v2076_v1 = vpack.c.bf16 %v807_v63, %v800_v61 }
 0x2dd   : > { %587 = vperm.xlu0 %1579, %v565_v29  }
 0x2e1   : > { %592 = vperm.xlu0 %1579, %v566_v54  }
 0x2e5   : > { %597 = vperm.xlu0 %1579, %v567_v25  }
 0x2e9   : > { %602 = vperm.xlu0 %1579, %v568_v26  }
 0x2ed   : > { %607 = vperm.xlu0 %1579, %v569_v32  }
 0x350   : > { %v573_v7 = vpop.permute.xlu0 %572 }
 0x351   : > { %v610_v13 = vmul.f32 %v573_v7, %v1924_v0  ;;  %v1191_v34 = vrot.slane %v573_v7, %v1962_v30 }
 0x353   : > { %v618_v20 = vsel %vm293_vm0, %v610_v13, 0.0 }
 0x354   : > { %v578_v8 = vpop.permute.xlu0 %577  ;;  %v619_v29 = vrot.slane %v618_v20, 4 }
 0x355   : > { %v611_v12 = vmul.f32 %v578_v8, %v1933_v5 }
 0x356   : > { %v620_v25 = vadd.f32 %v619_v29, %v618_v20 }
 0x357   : > { %v625_v19 = vsel %vm293_vm0, %v611_v12, 0.0 }
 0x358   : > { %v583_v14 = vpop.permute.xlu0 %582  ;;  %v626_v28 = vrot.slane %v625_v19, 4 }
 0x359   : > { %v612_v16 = vmul.f32 %v583_v14, %v1929_v2  ;;  %v1199_v36 = vrot.slane %v583_v14, %v1962_v30 }
 0x35a   : > { %v627_v2 = vadd.f32 %v626_v28, %v625_v19 }
 0x35b   : > { %v632_v22 = vsel %vm293_vm0, %v612_v16, 0.0 }
 0x35c   : > { %v588_v23 = vpop.permute.xlu0 %587  ;;  %v633_v31 = vrot.slane %v632_v22, 4  ;;  %v628_v11 = vrot.slane %v627_v2, 2 }
 0x35d   : > { %v613_v24 = vmul.f32 %v588_v23, %v1935_v6  ;;  %v1195_v6 = vrot.slane %v578_v8, %v1962_v30  ;;  %v1203_v38 = vrot.slane %v588_v23, %v1962_v30 }
 0x35e   : > { %v634_v56 = vadd.f32 %v633_v31, %v632_v22  ;;  %v629_v58 = vadd.f32 %v628_v11, %v627_v2 }
 0x35f   : > { %v639_v5 = vsel %vm293_vm0, %v613_v24, 0.0  ;;  %v1220_v49 = vsel %vm360_vm1, %v1195_v6, %v1191_v34 }
 0x360   : > { %v640_v54 = vrot.slane %v639_v5, 4  ;;  %v593_v0 = vpop.permute.xlu0 %592  ;;  %v635_v15 = vrot.slane %v634_v56, 2  ;;  %v1221_v59 = vsel %vm362_vm2, %v1199_v36, %v1220_v49  ;;  %v630_v29 = vrot.slane %v629_v58, 1 }
 0x361   : > { %v614_v55 = vmul.f32 %v593_v0, %v1939_v9  ;;  %v621_v9 = vrot.slane %v620_v25, 2  ;;  %v1207_v47 = vrot.slane %v593_v0, %v1962_v30  ;;  %v1222_v12 = vsel %vm364_vm3, %v1203_v38, %v1221_v59 }
 0x362   : > { %v641_v57 = vadd.f32 %v640_v54, %v639_v5  ;;  %v636_v8 = vadd.f32 %v635_v15, %v634_v56 }
 0x363   : > { %v646_v26 = vsel %vm293_vm0, %v614_v55, 0.0  ;;  %v622_v7 = vadd.f32 %v621_v9, %v620_v25  ;;  %v1223_v16 = vsel %vm366_vm4, %v1207_v47, %v1222_v12 }
 0x364   : > { %v647_v32 = vrot.slane %v646_v26, 4  ;;  %v598_v33 = vpop.permute.xlu0 %597  ;;  %v642_v45 = vrot.slane %v641_v57, 2  ;;  %v637_v0 = vrot.slane %v636_v8, 1 }
 0x365   : > { %v615_v62 = vmul.f32 %v598_v33, %v1941_v10  ;;  %v1211_v51 = vrot.slane %v598_v33, %v1962_v30  ;;  %v623_v25 = vrot.slane %v622_v7, 1 }
 0x366   : > { %v648_v37 = vadd.f32 %v647_v32, %v646_v26  ;;  %v643_v14 = vadd.f32 %v642_v45, %v641_v57 }
 0x367   : > { %v653_v44 = vsel %vm293_vm0, %v615_v62, 0.0  ;;  %v1224_v23 = vsel %vm368_vm5, %v1211_v51, %v1223_v16  ;;  %v638_v62 = vadd.f32 %v637_v0, %v636_v8  ;;  %v624_v34 = vadd.f32 %v623_v25, %v622_v7 }
 0x368   : > { %v654_v48 = vrot.slane %v653_v44, 4  ;;  %v603_v10 = vpop.permute.xlu0 %602  ;;  %v649_v50 = vrot.slane %v648_v37, 2  ;;  %v644_v56 = vrot.slane %v643_v14, 1 }
 0x369   : > { %v616_v52 = vmul.f32 %v603_v10, %v1949_v17  ;;  %v1215_v63 = vrot.slane %v603_v10, %v1962_v30 }
 0x36a   : > { %v655_v61 = vadd.f32 %v654_v48, %v653_v44  ;;  %v650_v17 = vadd.f32 %v649_v50, %v648_v37  ;;  %v645_v11 = vadd.f32 %v644_v56, %v643_v14 }
 0x36b   : > { %v660_v13 = vsel %vm293_vm0, %v616_v52, 0.0  ;;  %v1225_v54 = vsel %vm370_vm6, %v1215_v63, %v1224_v23 }
 0x36c   : > { %v656_v19 = vrot.slane %v655_v61, 2  ;;  %v661_v20 = vrot.slane %v660_v13, 4  ;;  %v608_v22 = vpop.permute.xlu0 %607  ;;  %v651_v32 = vrot.slane %v650_v17, 1 }
 0x36d   : > { %v617_v24 = vmul.f32 %v608_v22, %v1951_v18  ;;  %v1219_v28 = vrot.slane %v608_v22, %v1962_v30  ;;  %v631_v18 = vadd.f32 %v630_v29, %v629_v58 }
 0x36e   : > { %v657_v31 = vadd.f32 %v656_v19, %v655_v61  ;;  %v662_v5 = vadd.f32 %v661_v20, %v660_v13  ;;  %v652_v9 = vadd.f32 %v651_v32, %v650_v17 }
 0x36f   : > { %v667_v55 = vsel %vm293_vm0, %v617_v24, 0.0  ;;  %v1226_v2 = vsel %vm372_vm7, %v1219_v28, %v1225_v54  ;;  %v693_v15 = vsel %vm360_vm1, %v631_v18, %v624_v34 }
 0x370   : > { %v663_v26 = vrot.slane %v662_v5, 2  ;;  %v668_v57 = vrot.slane %v667_v55, 4  ;;  %1228 = vst.msk [vmem:[%s269_s7] sm:$0xff] %vm375_vm8, %v1226_v2  ;;  %v658_v33 = vrot.slane %v657_v31, 1  ;;  %v694_v45 = vsel %vm362_vm2, %v638_v62, %v693_v15 }
 0x371   : > { %v695_v48 = vsel %vm364_vm3, %v645_v11, %v694_v45 }
 0x372   : > { %v664_v30 = vadd.f32 %v663_v26, %v662_v5  ;;  %v669_v6 = vadd.f32 %v668_v57, %v667_v55  ;;  %v659_v38 = vadd.f32 %v658_v33, %v657_v31  ;;  %v696_v49 = vsel %vm366_vm4, %v652_v9, %v695_v48 }
 0x374   : > { %v665_v36 = vrot.slane %v664_v30, 1  ;;  %v670_v37 = vrot.slane %v669_v6, 2  ;;  %v697_v50 = vsel %vm368_vm5, %v659_v38, %v696_v49 }
 0x376   : > { %v671_v44 = vadd.f32 %v670_v37, %v669_v6  ;;  %v666_v47 = vadd.f32 %v665_v36, %v664_v30 }
 0x378   : > { %v672_v10 = vrot.slane %v671_v44, 1  ;;  %v698_v52 = vsel %vm370_vm6, %v666_v47, %v697_v50 }
 0x37a   : > { %v673_v51 = vadd.f32 %v672_v10, %v671_v44 }
 0x37c   : > { %v699_v58 = vsel %vm372_vm7, %v673_v51, %v698_v52 }
 0x37d   : > { %v700_v59 = vsel %vm293_vm0, %v699_v58, 0 }
 0x37e   : > { %v771_v61 = vand.u32 4294901760, %v700_v59 }
 0x380   : > { %v772_v63 = vsub.f32 %v700_v59, %v771_v61 }
 0x382   : > { %v773_v7 = vand.u32 4294901760, %v772_v63 }
 0x384   : > { %1445 = vmatmul.mubr.f32.vlgmr.msra.gmra.mrb[0].mxu0 %v773_v7  ;;  %v774_v8 = vsub.f32 %v772_v63, %v773_v7 }
 0x385   : > { %1495 = vmatpush3.bf16.msra.mxu0 %v2064_v46  ;;  %1455 = vmatprep.mubr.msk.f32.mxu0 %vm1734_vm9, %v1735_v39 }
 0x386   : > { %v775_v12 = vand.u32 4294901760, %v774_v8  ;;  %1496 = vmatprep.subr.bf16.mxu0 %v1733_v35 }
 0x388   : > { %1412 = vmatmul.mubr.f32.vlgmr.msra.gmra.mrb[0].mxu1 %v775_v12 }
 0x389   : > { %1477 = vmatpush3.bf16.msra.mxu1 %v2074_v60  ;;  %1498 = vmatpush3.bf16.msra.mxu0 %v2070_v53 }
 0x38a   : > { %1478 = vmatprep.subr.bf16.mxu1 %v1733_v35  ;;  %1499 = vmatprep.subr.bf16.mxu0 %v1733_v35 }
 0x38b   : > { %1422 = vmatprep.mubr.msk.f32.mxu1 %vm1734_vm9, %v1735_v39 }
 0x38c   : > { %1456 = vmatmul.mubr.f32.vlgmr.msra.gmra.mrb[0].mxu0 %v771_v61 }
 0x38d   : > { %1480 = vmatpush3.bf16.msra.mxu1 %v2076_v1  ;;  %1501 = vmatpush3.bf16.msra.mxu0 %v2042_v27 }
 0x38e   : > { %1481 = vmatprep.subr.bf16.mxu1 %v1733_v35  ;;  %1502 = vmatprep.subr.bf16.mxu0 %v1733_v35 }
 0x38f   : > { %1466 = vmatprep.mubr.msk.f32.mxu0 %vm1734_vm9, %v1735_v39 }
 0x390   : > { %1423 = vmatmul.mubr.f32.vlgmr.msra.gmra.mrb[0].mxu1 %v771_v61 }
 0x391   : > { %1483 = vmatpush3.bf16.msra.mxu1 %v1482_v3  ;;  %1504 = vmatpush3.bf16.msra.mxu0 %v2054_v43 }
 0x392   : > { %1484 = vmatprep.subr.bf16.mxu1 %v1733_v35  ;;  %1433 = vmatprep.mubr.msk.f32.mxu1 %vm1734_vm9, %v1735_v39 }
 0x394   : > { %1467 = vmatmul.mubr.f32.vlgmr.msra.gmra.mrb[0].mxu0 %v771_v61 }
 0x395   : > { %1486 = vmatpush3.bf16.msra.mxu1 %v1485_v4 }
 0x398   : > { %1434 = vmatmul.mubr.f32.vlgmr.msra.gmra.mrb[0].mxu1 %v772_v63 }
 0x467   : > { %v1183_v27 = vpop.f32.mrb[0].mxu0 }
 0x468   : > { %v1468_v46 = vpop.f32.mrb[1].mxu0 }
 0x46b   : > { %v948_v40 = vpop.f32.mrb[0].mxu1 }
 0x46c   : > { %v1505_v35 = vadd.f32 %v1367_v21, %v948_v40  ;;  %v1435_v39 = vpop.f32.mrb[1].mxu1 }
 0x46e   : > { %v1506_v43 = vadd.f32 %v1505_v35, %v1183_v27 }
 0x470   : > { %1187 = vst.msk [vmem:[%s258_s10] sm:$0xff] %vm293_vm0, %v1506_v43 }
 0x471   : > { %1669 = shalt.err (!%p1666_p9)
}
 0x472   : > { %s1670_s23 = scalar_lea.hbm %s2164_s26, 128  ;;  %s1674_s15 = scalar_lea.hbm %s2213_s4, 256 }
 0x473   : > { %p1671_p1 = scmp.ne.s32.totalorder %s2164_s26, %s1670_s23  ;;  %p1675_p2 = scmp.lt.u32.totalorder %s2164_s26, %s2213_s4 }
 0x474   : > { %p1676_p11 = scmp.lt.u32.totalorder %s1674_s15, %s1670_s23  ;;  %p1678_p6 = scmp.lt.u32.totalorder %s1670_s23, %s2164_s26 }
 0x475   : > { %p1672_p0 = pnand %p1671_p1, %p1861_p12 }
 0x476   : > { %p1677_p4 = por %p1676_p11, %p1675_p2 }
 0x477   : > { %p1673_p5 = pneg %p1672_p0 }
 0x478   : > { %p1679_p8 = por %p1678_p6, %p1677_p4 }
 0x47a   : > { %p1680_p10 = pnand %p1679_p8, %p1673_p5 }
 0x47c   : > { %1683 = shalt.err (!%p1680_p10)
}
 0x47d   : > { %1521 = dma.vmem_to_hbm [thread:$0]  (%p1861_p12), %s2166_s11, 128, %s2164_s26, %s1230_s16  }
 0x47e PF: > { %s1262_s27 = sand.u32 1, %s1714_s18   ;;  %p2229_p13 = scmp.ne.s32.totalorder %s2219_s25, 0 }
 0x47f   : > { %p2230_p3 = scmp.ge.s32.totalorder %s1726_s21, 2  ;;  %s1263_s10 = scalar_lea.sflag [#allocation4], %s1262_s27 }
 0x481   : > { %p1532_p7 = pnand %p2230_p3, %p2229_p13 }
 0x483   : > { %1709 = dma.done.wait (!%p1532_p7), %s1263_s10, 128  }
 0x484   : > { %1711 = vsyncadd (!%p1532_p7), %s1263_s10, 4294967168  ;;  %p20_p9 = scmp.ge.s32.totalorder %s1823_s30, 4   ;;  %s2231_s18 = smov %s1718_s19 }
 0x485   : > { %s2232_s19 = smov %s1722_s20  ;;  %s2233_s20 = smov %s1857_s8 }
 0x486   : > { %s2234_s21 = smov %s1823_s30  ;;  %22 = sbr.rel (!%p20_p9) target bundleno = 6 (0x6), region = 97 }
 0x48d   :  { %1275 = vsyncpa [#allocation3], 1 }
 0x48e   :  { %1277 = vsyncpa [#allocation3 + $0x1], 1 }
 0x48f   :  { %1278 = vsyncpa [#allocation6], 1 }
 0x490   :  { %1279 = vsyncpa [#allocation4], 1 }
 0x491   :  { %1281 = vsyncpa [#allocation4 + $0x1], 1 }

</bundles_post_ra>
